<compile_context>
chip_gen: v5e
topology: v5e:2x2
jax: 0.10.0
libtpu: 0.0.40
codegen_flags: <defaults>
</compile_context>

<pallas_src>
import functools
import math

import jax
import jax.numpy as jnp
from jax.experimental import pallas as pl
from jax.experimental.pallas import tpu as pltpu


def _round_up(n, m):
    return ((n + m - 1) // m) * m


def adain_connection_kernel(x_ref, w_ref, b_ref, o_ref):
    # x_ref: (TM, Cp)       input row tile (any float dtype)
    # w_ref: (8, Cp, Cp)    bf16 stacked (in, out) weights, resident all steps
    # b_ref: (8, 1, Cp)     f32 stacked biases
    # o_ref: (TM, Cp)
    x = x_ref[...].astype(jnp.float32)           # f32 residual carrier
    for blk in range(4):                         # static unroll: 4 Connections
        w1 = w_ref[2 * blk]                      # (Cp, Cp) bf16
        w2 = w_ref[2 * blk + 1]
        b1 = b_ref[2 * blk]                      # (1, Cp) f32
        b2 = b_ref[2 * blk + 1]

        h = jnp.dot(x.astype(jnp.bfloat16), w1,
                    preferred_element_type=jnp.float32)
        h = jnp.maximum(h + b1, 0.0)
        h = jnp.dot(h.astype(jnp.bfloat16), w2,
                    preferred_element_type=jnp.float32)
        h = jnp.maximum(h + b2, 0.0)
        x = x + h                                # Connection(x) + x

    o_ref[...] = x.astype(o_ref.dtype)


def pack_adain_params(params):
    """One-time packing of the 8 nn.Linear (W, b) pairs (PyTorch layout
    W:(out,in), b:(out,)) into MXU-ready stacks.

    Returns (w_stack bf16 (8,Cp,Cp), b_stack f32 (8,1,Cp), k, Cp), where k is
    the number of rows packed per 128-lane group (small-C fast path)."""
    assert len(params) == 8
    C = params[0][0].shape[0]
    for (w, b) in params:
        assert w.shape == (C, C) and b.shape == (C,), (
            "AdaINConnection residual requires in_ch == out_ch")

    if C < 128 and 128 % C == 0:
        # Small-C fast path: k rows share one 128-lane group; block-diagonal
        # weights keep the row groups independent, bias is tiled k times.
        k, Cp = 128 // C, 128
        eye = jnp.eye(k, dtype=jnp.float32)
        w_stack = jnp.stack(
            [jnp.kron(eye, w.T.astype(jnp.float32)) for (w, _) in params])
        b_stack = jnp.stack(
            [jnp.tile(b.astype(jnp.float32), k)[None, :] for (_, b) in params])
    elif C % 128 == 0:
        k, Cp = 1, C
        w_stack = jnp.stack([w.T.astype(jnp.float32) for (w, _) in params])
        b_stack = jnp.stack([b.astype(jnp.float32)[None, :] for (_, b) in params])
    else:
        # General case: lane-pad channels.  Padded lanes stay exactly zero
        # because both W and b are zero-padded.
        k, Cp = 1, _round_up(C, 128)
        w_stack = jnp.zeros((8, Cp, Cp), jnp.float32)
        b_stack = jnp.zeros((8, 1, Cp), jnp.float32)
        for i, (w, b) in enumerate(params):
            w_stack = w_stack.at[i, :C, :C].set(w.T.astype(jnp.float32))
            b_stack = b_stack.at[i, 0, :C].set(b.astype(jnp.float32))

    return w_stack.astype(jnp.bfloat16), b_stack, k, Cp


def adain_connection_packed(x, w_stack, b_stack, *, k, Cp, row_tile=1024,
                            out_dtype=None):
    """x: (..., C) float.  w_stack/b_stack/k/Cp from pack_adain_params().
    Returns same shape as x (dtype = x.dtype unless out_dtype is given)."""
    C = x.shape[-1]
    lead = x.shape[:-1]
    rows = math.prod(lead) if lead else 1
    out_dtype = x.dtype if out_dtype is None else out_dtype

    x2 = x.reshape(rows, C)
    row_pad = 0
    if k > 1:
        # Free contiguous reshape: k consecutive rows share one 128-lane row.
        if rows % k:
            row_pad = k - rows % k
            x2 = jnp.concatenate([x2, jnp.zeros((row_pad, C), x2.dtype)], axis=0)
        rows_packed = (rows + row_pad) // k
        xk = x2.reshape(rows_packed, Cp)
    else:
        rows_packed = rows
        xk = x2 if Cp == C else jnp.zeros((rows, Cp), x2.dtype).at[:, :C].set(x2)

    # Row tiling: one full block for small row counts (block dim == array dim
    # is always legal); otherwise 8-aligned tiles, an even number of them (for
    # v7x's two TensorCores), and the partial tail block is handled by Pallas
    # write masking (rows are independent, so OOB garbage never leaks).
    if rows_packed <= 512:
        tm, n_tiles = rows_packed, 1
    else:
        tm = min(row_tile, _round_up(-(-rows_packed // 2), 8))
        n_tiles = -(-rows_packed // tm)
        if n_tiles % 2:
            n_tiles += 1
            tm = _round_up(-(-rows_packed // n_tiles), 8)
            n_tiles = -(-rows_packed // tm)

    in_bytes = jnp.dtype(x.dtype).itemsize
    out_bytes = jnp.dtype(out_dtype).itemsize
    vmem_need = (2 * tm * Cp * (in_bytes + out_bytes)      # pipelined in/out
                 + 2 * 8 * Cp * Cp * 2 + 2 * 8 * Cp * 4    # resident weights/bias
                 + 6 * tm * Cp * 4)                        # in-kernel temporaries
    # <= 48 MiB keeps v7x's 64 MiB physical VMEM safe; raises the 16/32 MiB
    # default scoped limit on v5e/v6e for big row tiles.
    vmem_limit = int(min(max(vmem_need, 32 * 1024 * 1024), 48 * 1024 * 1024))

    cost = pl.CostEstimate(
        flops=int(16 * rows_packed * Cp * Cp),
        transcendentals=0,
        bytes_accessed=int(rows_packed * Cp * (in_bytes + out_bytes)
                           + 8 * Cp * Cp * 2 + 8 * Cp * 4),
    )

    out = pl.pallas_call(
        adain_connection_kernel,
        out_shape=jax.ShapeDtypeStruct((rows_packed, Cp), out_dtype),
        grid=(n_tiles,),
        in_specs=[
            pl.BlockSpec((tm, Cp), lambda i: (i, 0)),
            # Constant index maps: weights/biases are fetched once and stay
            # VMEM-resident across grid steps.
            # TODO(synk): for very large C (Cp >= ~1024 on v7x's 64 MiB VMEM)
            # switch to K/N-tiled matmuls with an f32 accumulator and
            # single-buffered weight blocks instead of fully resident weights.
            pl.BlockSpec((8, Cp, Cp), lambda i: (0, 0, 0)),
            pl.BlockSpec((8, 1, Cp), lambda i: (0, 0, 0)),
        ],
        out_specs=pl.BlockSpec((tm, Cp), lambda i: (i, 0)),
        compiler_params=pltpu.CompilerParams(
            dimension_semantics=("parallel",),
            vmem_limit_bytes=vmem_limit),
        cost_estimate=cost,
    )(xk, w_stack, b_stack)

    if k > 1:
        out = out.reshape(rows + row_pad, C)     # free reshape (k*C == Cp)
        if row_pad:
            out = out[:rows]
    elif Cp != C:
        out = out[:, :C]
    return out.reshape(*lead, C)


def adain_connection(x, params, *, row_tile=1024, out_dtype=None):
    """Convenience wrapper (packs weights per call).  For repeated calls,
    prefer pack_adain_params() once + jit(adain_connection_packed)."""
    w_stack, b_stack, k, Cp = pack_adain_params(params)
    return adain_connection_packed(x, w_stack, b_stack, k=k, Cp=Cp,
                                   row_tile=row_tile, out_dtype=out_dtype)


# ---------------- pure-JAX reference (PyTorch semantics) ----------------
def ref_forward(x, params):
    h = x.astype(jnp.float32)
    for blk in range(4):
        w1, b1 = params[2 * blk]
        w2, b2 = params[2 * blk + 1]
        y = jnp.maximum(h @ w1.T + b1, 0.0)
        y = jnp.maximum(y @ w2.T + b2, 0.0)
        h = y + h
    return h


def init_params(key, ch):
    keys = jax.random.split(key, 16)
    params = []
    bound = 1.0 / float(ch) ** 0.5
    for i in range(8):
        w = jax.random.uniform(keys[2 * i], (ch, ch), jnp.float32,
                               minval=-bound, maxval=bound)
        b = jax.random.uniform(keys[2 * i + 1], (ch,), jnp.float32,
                               minval=-bound, maxval=bound)
        params.append((w, b))
    return tuple(params)


if __name__ == "__main__":
    key = jax.random.PRNGKey(0)
    kx, kp = jax.random.split(key)

    B, S, C = 2, 8, 32           # batch, seq, hidden (in_ch == out_ch)
    x = jax.random.normal(kx, (B, S, C), jnp.float32)
    params = init_params(kp, C)

    # One-time weight packing (hoisted out of the forward path) + jitted fwd.
    w_stack, b_stack, k, Cp = pack_adain_params(params)
    fwd = jax.jit(functools.partial(adain_connection_packed, k=k, Cp=Cp))

    out = jax.block_until_ready(fwd(x, w_stack, b_stack))
    assert out.shape == (B, S, C), out.shape

    ref = ref_forward(x, params)
    max_err = float(jnp.max(jnp.abs(out - ref)))
    tol = 5e-2 * (float(jnp.max(jnp.abs(ref))) + 1.0)   # bf16-MXU tolerance
    assert max_err < tol, f"max abs error too large: {max_err} (tol {tol})"

    print("KERNEL_OK")
</pallas_src>

<mosaic_0001>
module attributes {stable_mosaic.version = 11 : i64} {
  func.func @adain_connection_kernel(%arg0: i32, %arg1: memref<4x128xf32, #tpu.memory_space<vmem>>, %arg2: memref<8x128x128xbf16, #tpu.memory_space<vmem>>, %arg3: memref<8x1x128xf32, #tpu.memory_space<vmem>>, %arg4: memref<4x128xf32, #tpu.memory_space<vmem>>) attributes {dimension_semantics = [#tpu.dimension_semantics<parallel>], iteration_bounds = array<i64: 1>, scalar_prefetch = 0 : i64, scratch_operands = 0 : i64, tpu.core_type = #tpu.core_type<tc>, window_params = [{transform_indices = @transform_0, window_bounds = array<i64: 4, 128>}, {pipeline_mode = #tpu.pipeline_mode<synchronous>, transform_indices = @transform_1, window_bounds = array<i64: 8, 128, 128>}, {pipeline_mode = #tpu.pipeline_mode<synchronous>, transform_indices = @transform_2, window_bounds = array<i64: 8, 1, 128>}, {transform_indices = @transform_3, window_bounds = array<i64: 4, 128>}]} {
    %c0 = arith.constant 0 : index
    %c0_0 = arith.constant 0 : index
    %0 = vector.load %arg1[%c0, %c0_0] : memref<4x128xf32, #tpu.memory_space<vmem>>, vector<4x128xf32>
    %c0_1 = arith.constant 0 : index
    %c0_2 = arith.constant 0 : index
    %c0_3 = arith.constant 0 : index
    %1 = vector.load %arg2[%c0_1, %c0_2, %c0_3] : memref<8x128x128xbf16, #tpu.memory_space<vmem>>, vector<1x128x128xbf16>
    %2 = vector.shape_cast %1 : vector<1x128x128xbf16> to vector<128x128xbf16>
    %c1 = arith.constant 1 : index
    %c0_4 = arith.constant 0 : index
    %c0_5 = arith.constant 0 : index
    %3 = vector.load %arg2[%c1, %c0_4, %c0_5] : memref<8x128x128xbf16, #tpu.memory_space<vmem>>, vector<1x128x128xbf16>
    %4 = vector.shape_cast %3 : vector<1x128x128xbf16> to vector<128x128xbf16>
    %c0_6 = arith.constant 0 : index
    %c0_7 = arith.constant 0 : index
    %c0_8 = arith.constant 0 : index
    %5 = vector.load %arg3[%c0_6, %c0_7, %c0_8] : memref<8x1x128xf32, #tpu.memory_space<vmem>>, vector<1x1x128xf32>
    %6 = vector.shape_cast %5 : vector<1x1x128xf32> to vector<1x128xf32>
    %c1_9 = arith.constant 1 : index
    %c0_10 = arith.constant 0 : index
    %c0_11 = arith.constant 0 : index
    %7 = vector.load %arg3[%c1_9, %c0_10, %c0_11] : memref<8x1x128xf32, #tpu.memory_space<vmem>>, vector<1x1x128xf32>
    %8 = vector.shape_cast %7 : vector<1x1x128xf32> to vector<1x128xf32>
    %9 = arith.truncf %0 : vector<4x128xf32> to vector<4x128xbf16>
    %cst = arith.constant dense<0.000000e+00> : vector<4x128xf32>
    %10 = tpu.matmul %9, %2, %cst {dimension_numbers = #tpu.dot_dimension_numbers<[1], [0], [0], [1], [0, 0, 1, 1], [], []>} : vector<4x128xbf16>, vector<128x128xbf16>, vector<4x128xf32> -> vector<4x128xf32>
    %11 = vector.broadcast %6 : vector<1x128xf32> to vector<4x128xf32>
    %12 = arith.addf %10, %11 : vector<4x128xf32>
    %cst_12 = arith.constant 0.000000e+00 : f32
    %13 = vector.broadcast %cst_12 : f32 to vector<4x128xf32>
    %14 = arith.maximumf %12, %13 : vector<4x128xf32>
    %15 = arith.truncf %14 : vector<4x128xf32> to vector<4x128xbf16>
    %cst_13 = arith.constant dense<0.000000e+00> : vector<4x128xf32>
    %16 = tpu.matmul %15, %4, %cst_13 {dimension_numbers = #tpu.dot_dimension_numbers<[1], [0], [0], [1], [0, 0, 1, 1], [], []>} : vector<4x128xbf16>, vector<128x128xbf16>, vector<4x128xf32> -> vector<4x128xf32>
    %17 = vector.broadcast %8 : vector<1x128xf32> to vector<4x128xf32>
    %18 = arith.addf %16, %17 : vector<4x128xf32>
    %cst_14 = arith.constant 0.000000e+00 : f32
    %19 = vector.broadcast %cst_14 : f32 to vector<4x128xf32>
    %20 = arith.maximumf %18, %19 : vector<4x128xf32>
    %21 = arith.addf %0, %20 : vector<4x128xf32>
    %c2 = arith.constant 2 : index
    %c0_15 = arith.constant 0 : index
    %c0_16 = arith.constant 0 : index
    %22 = vector.load %arg2[%c2, %c0_15, %c0_16] : memref<8x128x128xbf16, #tpu.memory_space<vmem>>, vector<1x128x128xbf16>
    %23 = vector.shape_cast %22 : vector<1x128x128xbf16> to vector<128x128xbf16>
    %c3 = arith.constant 3 : index
    %c0_17 = arith.constant 0 : index
    %c0_18 = arith.constant 0 : index
    %24 = vector.load %arg2[%c3, %c0_17, %c0_18] : memref<8x128x128xbf16, #tpu.memory_space<vmem>>, vector<1x128x128xbf16>
    %25 = vector.shape_cast %24 : vector<1x128x128xbf16> to vector<128x128xbf16>
    %c2_19 = arith.constant 2 : index
    %c0_20 = arith.constant 0 : index
    %c0_21 = arith.constant 0 : index
    %26 = vector.load %arg3[%c2_19, %c0_20, %c0_21] : memref<8x1x128xf32, #tpu.memory_space<vmem>>, vector<1x1x128xf32>
    %27 = vector.shape_cast %26 : vector<1x1x128xf32> to vector<1x128xf32>
    %c3_22 = arith.constant 3 : index
    %c0_23 = arith.constant 0 : index
    %c0_24 = arith.constant 0 : index
    %28 = vector.load %arg3[%c3_22, %c0_23, %c0_24] : memref<8x1x128xf32, #tpu.memory_space<vmem>>, vector<1x1x128xf32>
    %29 = vector.shape_cast %28 : vector<1x1x128xf32> to vector<1x128xf32>
    %30 = arith.truncf %21 : vector<4x128xf32> to vector<4x128xbf16>
    %cst_25 = arith.constant dense<0.000000e+00> : vector<4x128xf32>
    %31 = tpu.matmul %30, %23, %cst_25 {dimension_numbers = #tpu.dot_dimension_numbers<[1], [0], [0], [1], [0, 0, 1, 1], [], []>} : vector<4x128xbf16>, vector<128x128xbf16>, vector<4x128xf32> -> vector<4x128xf32>
    %32 = vector.broadcast %27 : vector<1x128xf32> to vector<4x128xf32>
    %33 = arith.addf %31, %32 : vector<4x128xf32>
    %cst_26 = arith.constant 0.000000e+00 : f32
    %34 = vector.broadcast %cst_26 : f32 to vector<4x128xf32>
    %35 = arith.maximumf %33, %34 : vector<4x128xf32>
    %36 = arith.truncf %35 : vector<4x128xf32> to vector<4x128xbf16>
    %cst_27 = arith.constant dense<0.000000e+00> : vector<4x128xf32>
    %37 = tpu.matmul %36, %25, %cst_27 {dimension_numbers = #tpu.dot_dimension_numbers<[1], [0], [0], [1], [0, 0, 1, 1], [], []>} : vector<4x128xbf16>, vector<128x128xbf16>, vector<4x128xf32> -> vector<4x128xf32>
    %38 = vector.broadcast %29 : vector<1x128xf32> to vector<4x128xf32>
    %39 = arith.addf %37, %38 : vector<4x128xf32>
    %cst_28 = arith.constant 0.000000e+00 : f32
    %40 = vector.broadcast %cst_28 : f32 to vector<4x128xf32>
    %41 = arith.maximumf %39, %40 : vector<4x128xf32>
    %42 = arith.addf %21, %41 : vector<4x128xf32>
    %c4 = arith.constant 4 : index
    %c0_29 = arith.constant 0 : index
    %c0_30 = arith.constant 0 : index
    %43 = vector.load %arg2[%c4, %c0_29, %c0_30] : memref<8x128x128xbf16, #tpu.memory_space<vmem>>, vector<1x128x128xbf16>
    %44 = vector.shape_cast %43 : vector<1x128x128xbf16> to vector<128x128xbf16>
    %c5 = arith.constant 5 : index
    %c0_31 = arith.constant 0 : index
    %c0_32 = arith.constant 0 : index
    %45 = vector.load %arg2[%c5, %c0_31, %c0_32] : memref<8x128x128xbf16, #tpu.memory_space<vmem>>, vector<1x128x128xbf16>
    %46 = vector.shape_cast %45 : vector<1x128x128xbf16> to vector<128x128xbf16>
    %c4_33 = arith.constant 4 : index
    %c0_34 = arith.constant 0 : index
    %c0_35 = arith.constant 0 : index
    %47 = vector.load %arg3[%c4_33, %c0_34, %c0_35] : memref<8x1x128xf32, #tpu.memory_space<vmem>>, vector<1x1x128xf32>
    %48 = vector.shape_cast %47 : vector<1x1x128xf32> to vector<1x128xf32>
    %c5_36 = arith.constant 5 : index
    %c0_37 = arith.constant 0 : index
    %c0_38 = arith.constant 0 : index
    %49 = vector.load %arg3[%c5_36, %c0_37, %c0_38] : memref<8x1x128xf32, #tpu.memory_space<vmem>>, vector<1x1x128xf32>
    %50 = vector.shape_cast %49 : vector<1x1x128xf32> to vector<1x128xf32>
    %51 = arith.truncf %42 : vector<4x128xf32> to vector<4x128xbf16>
    %cst_39 = arith.constant dense<0.000000e+00> : vector<4x128xf32>
    %52 = tpu.matmul %51, %44, %cst_39 {dimension_numbers = #tpu.dot_dimension_numbers<[1], [0], [0], [1], [0, 0, 1, 1], [], []>} : vector<4x128xbf16>, vector<128x128xbf16>, vector<4x128xf32> -> vector<4x128xf32>
    %53 = vector.broadcast %48 : vector<1x128xf32> to vector<4x128xf32>
    %54 = arith.addf %52, %53 : vector<4x128xf32>
    %cst_40 = arith.constant 0.000000e+00 : f32
    %55 = vector.broadcast %cst_40 : f32 to vector<4x128xf32>
    %56 = arith.maximumf %54, %55 : vector<4x128xf32>
    %57 = arith.truncf %56 : vector<4x128xf32> to vector<4x128xbf16>
    %cst_41 = arith.constant dense<0.000000e+00> : vector<4x128xf32>
    %58 = tpu.matmul %57, %46, %cst_41 {dimension_numbers = #tpu.dot_dimension_numbers<[1], [0], [0], [1], [0, 0, 1, 1], [], []>} : vector<4x128xbf16>, vector<128x128xbf16>, vector<4x128xf32> -> vector<4x128xf32>
    %59 = vector.broadcast %50 : vector<1x128xf32> to vector<4x128xf32>
    %60 = arith.addf %58, %59 : vector<4x128xf32>
    %cst_42 = arith.constant 0.000000e+00 : f32
    %61 = vector.broadcast %cst_42 : f32 to vector<4x128xf32>
    %62 = arith.maximumf %60, %61 : vector<4x128xf32>
    %63 = arith.addf %42, %62 : vector<4x128xf32>
    %c6 = arith.constant 6 : index
    %c0_43 = arith.constant 0 : index
    %c0_44 = arith.constant 0 : index
    %64 = vector.load %arg2[%c6, %c0_43, %c0_44] : memref<8x128x128xbf16, #tpu.memory_space<vmem>>, vector<1x128x128xbf16>
    %65 = vector.shape_cast %64 : vector<1x128x128xbf16> to vector<128x128xbf16>
    %c7 = arith.constant 7 : index
    %c0_45 = arith.constant 0 : index
    %c0_46 = arith.constant 0 : index
    %66 = vector.load %arg2[%c7, %c0_45, %c0_46] : memref<8x128x128xbf16, #tpu.memory_space<vmem>>, vector<1x128x128xbf16>
    %67 = vector.shape_cast %66 : vector<1x128x128xbf16> to vector<128x128xbf16>
    %c6_47 = arith.constant 6 : index
    %c0_48 = arith.constant 0 : index
    %c0_49 = arith.constant 0 : index
    %68 = vector.load %arg3[%c6_47, %c0_48, %c0_49] : memref<8x1x128xf32, #tpu.memory_space<vmem>>, vector<1x1x128xf32>
    %69 = vector.shape_cast %68 : vector<1x1x128xf32> to vector<1x128xf32>
    %c7_50 = arith.constant 7 : index
    %c0_51 = arith.constant 0 : index
    %c0_52 = arith.constant 0 : index
    %70 = vector.load %arg3[%c7_50, %c0_51, %c0_52] : memref<8x1x128xf32, #tpu.memory_space<vmem>>, vector<1x1x128xf32>
    %71 = vector.shape_cast %70 : vector<1x1x128xf32> to vector<1x128xf32>
    %72 = arith.truncf %63 : vector<4x128xf32> to vector<4x128xbf16>
    %cst_53 = arith.constant dense<0.000000e+00> : vector<4x128xf32>
    %73 = tpu.matmul %72, %65, %cst_53 {dimension_numbers = #tpu.dot_dimension_numbers<[1], [0], [0], [1], [0, 0, 1, 1], [], []>} : vector<4x128xbf16>, vector<128x128xbf16>, vector<4x128xf32> -> vector<4x128xf32>
    %74 = vector.broadcast %69 : vector<1x128xf32> to vector<4x128xf32>
    %75 = arith.addf %73, %74 : vector<4x128xf32>
    %cst_54 = arith.constant 0.000000e+00 : f32
    %76 = vector.broadcast %cst_54 : f32 to vector<4x128xf32>
    %77 = arith.maximumf %75, %76 : vector<4x128xf32>
    %78 = arith.truncf %77 : vector<4x128xf32> to vector<4x128xbf16>
    %cst_55 = arith.constant dense<0.000000e+00> : vector<4x128xf32>
    %79 = tpu.matmul %78, %67, %cst_55 {dimension_numbers = #tpu.dot_dimension_numbers<[1], [0], [0], [1], [0, 0, 1, 1], [], []>} : vector<4x128xbf16>, vector<128x128xbf16>, vector<4x128xf32> -> vector<4x128xf32>
    %80 = vector.broadcast %71 : vector<1x128xf32> to vector<4x128xf32>
    %81 = arith.addf %79, %80 : vector<4x128xf32>
    %cst_56 = arith.constant 0.000000e+00 : f32
    %82 = vector.broadcast %cst_56 : f32 to vector<4x128xf32>
    %83 = arith.maximumf %81, %82 : vector<4x128xf32>
    %84 = arith.addf %63, %83 : vector<4x128xf32>
    %c0_57 = arith.constant 0 : index
    %c0_58 = arith.constant 0 : index
    %85 = vector.load %arg4[%c0_57, %c0_58] : memref<4x128xf32, #tpu.memory_space<vmem>>, vector<4x128xf32>
    tpu.vector_store %arg4[%c0_57, %c0_58], %84 {strides = array<i32>} : memref<4x128xf32, #tpu.memory_space<vmem>>, vector<4x128xf32>,
    return
  }
  func.func @transform_0(%arg0: i32) -> (i32, i32) {
    %c0_i32 = arith.constant 0 : i32
    %c0_i32_0 = arith.constant 0 : i32
    return %arg0, %c0_i32 : i32, i32
  }
  func.func @transform_1(%arg0: i32) -> (i32, i32, i32) {
    %c0_i32 = arith.constant 0 : i32
    %c0_i32_0 = arith.constant 0 : i32
    %c0_i32_1 = arith.constant 0 : i32
    %c0_i32_2 = arith.constant 0 : i32
    return %c0_i32, %c0_i32_0, %c0_i32_1 : i32, i32, i32
  }
  func.func @transform_2(%arg0: i32) -> (i32, i32, i32) {
    %c0_i32 = arith.constant 0 : i32
    %c0_i32_0 = arith.constant 0 : i32
    %c0_i32_1 = arith.constant 0 : i32
    %c0_i32_2 = arith.constant 0 : i32
    return %c0_i32, %c0_i32_0, %c0_i32_1 : i32, i32, i32
  }
  func.func @transform_3(%arg0: i32) -> (i32, i32) {
    %c0_i32 = arith.constant 0 : i32
    %c0_i32_0 = arith.constant 0 : i32
    return %arg0, %c0_i32 : i32, i32
  }
}

</mosaic_0001>

<bundles_post_ra>
// kernel: adain_connection_packed.1
= control target key start
LH: loop header
LB: loop body
LE: loop exit
PB: predicated region body
PF: predicated region fallthrough
CT: control target
= control target key end

     0   :  { %8 = vsyncpa [#allocation3], 0  ;;  %s1083_s15 = smov [#allocation2]   ;;  %s1084_s17 = smov 64   ;;  %s1139_s0 = inlined_call_operand.vmem [shape: f32[4,128], index: 0, kind: input, shape index: {}]   ;;  %s1140_s1 = inlined_call_operand.hbm [shape: bf16[8,128,128], index: 1, kind: input, shape index: {}]   ;;  %s1141_s2 = inlined_call_operand.vmem [shape: f32[8,1,128], index: 2, kind: input, shape index: {}]   ;;  %s1142_s3 = inlined_call_operand.vmem [shape: f32[4,128], index: 3, kind: output, shape index: {}]  }
   0x1   :  { %s15_s14 = sshll.u32 %s1140_s1, 4  ;;  %s17_s16 = sshll.u32 %s1083_s15, 4  ;;  %s16_s14 = int_to_ptr.hbm [resolvable:$true] %s15_s14  ;;  %s18_s16 = int_to_ptr.vmem [resolvable:$true] %s17_s16 }
   0x2   :  { %s1085_s18 = smov 4  }
   0x3   :  { %23 = dma.hbm_to_vmem [thread:$0]  %s16_s14, 8192, %s18_s16, [#allocation3], %s1084_s17, %s1084_s17, %s1085_s18  }
   0x4   :  { %1081 = dma.done.wait [#allocation3], 8192  }
   0x5   :  { %1082 = vsyncadd [#allocation3], 4294959104  ;;  %v989_v0 = vld [vmem:[#allocation2 + $0x38] sm:$0xff]  ;;  %v988_v1 = vld [vmem:[#allocation2 + $0x30] sm:$0xff] }
   0x6   :  { %119 = vmatpush.bf16.msra.mxu0 %v989_v0  ;;  %v997_v2 = vld [vmem:[#allocation2 + $0x78] sm:$0xff]  ;;  %v987_v3 = vld [vmem:[#allocation2 + $0x28] sm:$0xff]  ;;  %v996_v4 = vld [vmem:[#allocation2 + $0x70] sm:$0xff] }
   0x7   :  { %185 = vmatpush.bf16.msra.mxu1 %v997_v2  ;;  %v995_v5 = vld [vmem:[#allocation2 + $0x68] sm:$0xff]  ;;  %v986_v6 = vld [vmem:[#allocation2 + $0x20] sm:$0xff]  ;;  %v985_v8 = vld [vmem:[#allocation2 + $0x18] sm:$0xff] }
   0x8   :  { %v994_v7 = vld [vmem:[#allocation2 + $0x60] sm:$0xff]  ;;  %v993_v9 = vld [vmem:[#allocation2 + $0x58] sm:$0xff]  ;;  %v984_v10 = vld [vmem:[#allocation2 + $0x10] sm:$0xff] }
   0x9   :  { %v992_v11 = vld [vmem:[#allocation2 + $0x50] sm:$0xff]  ;;  %v983_v12 = vld [vmem:[#allocation2 + $0x8] sm:$0xff]  ;;  %v982_v13 = vld [vmem:[#allocation2] sm:$0xff] }
   0xa   :  { %120 = vmatpush.bf16.msra.mxu0 %v988_v1  ;;  %v30_v14 = vld [vmem:[%s1139_s0] sm:$0xf]  ;;  %v991_v16 = vld [vmem:[#allocation2 + $0x48] sm:$0xff]  ;;  %v1005_v18 = vld [vmem:[#allocation2 + $0xb8] sm:$0xff] }
   0xb   :  { %186 = vmatpush.bf16.msra.mxu1 %v996_v4  ;;  %v67_v15 = vpack.c.bf16 %v30_v14, %v30_v14  ;;  %v990_v17 = vld [vmem:[#allocation2 + $0x40] sm:$0xff]  ;;  %290 = vmatpush.bf16.msra.mxu2 %v1005_v18  ;;  %v1004_v19 = vld [vmem:[#allocation2 + $0xb0] sm:$0xff]  ;;  %v1003_v20 = vld [vmem:[#allocation2 + $0xa8] sm:$0xff] }
   0xc   :  { %v1002_v21 = vld [vmem:[#allocation2 + $0xa0] sm:$0xff]  ;;  %v1001_v22 = vld [vmem:[#allocation2 + $0x98] sm:$0xff]  ;;  %v1000_v23 = vld [vmem:[#allocation2 + $0x90] sm:$0xff] }
   0xd   :  { %v1049_v24 = vld [vmem:[%s1141_s2] ss:$0 sm:$0xff]  ;;  %v999_v30 = vld [vmem:[#allocation2 + $0x88] sm:$0xff]  ;;  %v1013_v32 = vld [vmem:[#allocation2 + $0xf8] sm:$0xff] }
   0xe   :  { %121 = vmatpush.bf16.msra.mxu0 %v987_v3  ;;  %v998_v31 = vld [vmem:[#allocation2 + $0x80] sm:$0xff]  ;;  %356 = vmatpush.bf16.msra.mxu3 %v1013_v32  ;;  %v1012_v33 = vld [vmem:[#allocation2 + $0xf0] sm:$0xff]  ;;  %v1011_v34 = vld [vmem:[#allocation2 + $0xe8] sm:$0xff] }
   0xf   :  { %187 = vmatpush.bf16.msra.mxu1 %v995_v5  ;;  %291 = vmatpush.bf16.msra.mxu2 %v1004_v19  ;;  %v1010_v35 = vld [vmem:[#allocation2 + $0xe0] sm:$0xff]  ;;  %v1009_v36 = vld [vmem:[#allocation2 + $0xd8] sm:$0xff]  ;;  %v1008_v37 = vld [vmem:[#allocation2 + $0xd0] sm:$0xff] }
  0x10   :  { %v1050_v38 = vld [vmem:[%s1141_s2 + $0x1] ss:$0 sm:$0xff]  ;;  %v1007_v45 = vld [vmem:[#allocation2 + $0xc8] sm:$0xff]  ;;  %v1021_v47 = vld [vmem:[#allocation2 + $0x138] sm:$0xff] }
  0x11   :  { %v1006_v46 = vld [vmem:[#allocation2 + $0xc0] sm:$0xff]  ;;  %v1020_v48 = vld [vmem:[#allocation2 + $0x130] sm:$0xff]  ;;  %v1019_v49 = vld [vmem:[#allocation2 + $0x128] sm:$0xff] }
  0x12   :  { %122 = vmatpush.bf16.msra.mxu0 %v986_v6  ;;  %357 = vmatpush.bf16.msra.mxu3 %v1012_v33  ;;  %v1018_v50 = vld [vmem:[#allocation2 + $0x120] sm:$0xff]  ;;  %v1017_v51 = vld [vmem:[#allocation2 + $0x118] sm:$0xff]  ;;  %v1016_v52 = vld [vmem:[#allocation2 + $0x110] sm:$0xff] }
  0x13   :  { %188 = vmatpush.bf16.msra.mxu1 %v994_v7  ;;  %292 = vmatpush.bf16.msra.mxu2 %v1003_v20  ;;  %v1051_v53 = vld [vmem:[%s1141_s2 + $0x2] ss:$0 sm:$0xff]  ;;  %v1015_v59 = vld [vmem:[#allocation2 + $0x108] sm:$0xff]  ;;  %v1029_v61 = vld [vmem:[#allocation2 + $0x178] sm:$0xff] }
  0x14   :  { %v1014_v60 = vld [vmem:[#allocation2 + $0x100] sm:$0xff]  ;;  %v1028_v62 = vld [vmem:[#allocation2 + $0x170] sm:$0xff]  ;;  %v1027_v63 = vld [vmem:[#allocation2 + $0x168] sm:$0xff] }
  0x15   :  { %v1026_v0 = vld [vmem:[#allocation2 + $0x160] sm:$0xff]  ;;  %v1025_v1 = vld [vmem:[#allocation2 + $0x158] sm:$0xff]  ;;  %v1024_v2 = vld [vmem:[#allocation2 + $0x150] sm:$0xff] }
  0x16   :  { %123 = vmatpush.bf16.msra.mxu0 %v985_v8  ;;  %358 = vmatpush.bf16.msra.mxu3 %v1011_v34  ;;  %v1052_v3 = vld [vmem:[%s1141_s2 + $0x3] ss:$0 sm:$0xff]  ;;  %v1053_v18 = vld [vmem:[%s1141_s2 + $0x4] ss:$0 sm:$0xff]  ;;  %v1054_v32 = vld [vmem:[%s1141_s2 + $0x5] ss:$0 sm:$0xff] }
  0x17   :  { %189 = vmatpush.bf16.msra.mxu1 %v993_v9  ;;  %293 = vmatpush.bf16.msra.mxu2 %v1002_v21 }
  0x1a   :  { %124 = vmatpush.bf16.msra.mxu0 %v984_v10  ;;  %359 = vmatpush.bf16.msra.mxu3 %v1010_v35  ;;  %v1023_v10 = vld [vmem:[#allocation2 + $0x148] sm:$0xff] }
  0x1b   :  { %190 = vmatpush.bf16.msra.mxu1 %v992_v11  ;;  %294 = vmatpush.bf16.msra.mxu2 %v1001_v22  ;;  %v1022_v11 = vld [vmem:[#allocation2 + $0x140] sm:$0xff] }
  0x1e   :  { %125 = vmatpush.bf16.msra.mxu0 %v983_v12  ;;  %360 = vmatpush.bf16.msra.mxu3 %v1009_v36  ;;  %v1037_v12 = vld [vmem:[#allocation2 + $0x1b8] sm:$0xff] }
  0x1f   :  { %191 = vmatpush.bf16.msra.mxu1 %v991_v16  ;;  %295 = vmatpush.bf16.msra.mxu2 %v1000_v23  ;;  %v1033_v16 = vld [vmem:[#allocation2 + $0x198] sm:$0xff] }
  0x22   :  { %126 = vmatpush.bf16.msra.mxu0 %v982_v13  ;;  %361 = vmatpush.bf16.msra.mxu3 %v1008_v37  ;;  %v1036_v13 = vld [vmem:[#allocation2 + $0x1b0] sm:$0xff] }
  0x23   :  { %192 = vmatpush.bf16.msra.mxu1 %v990_v17  ;;  %296 = vmatpush.bf16.msra.mxu2 %v999_v30  ;;  %v1032_v17 = vld [vmem:[#allocation2 + $0x190] sm:$0xff]  ;;  %v1041_v30 = vld [vmem:[#allocation2 + $0x1d8] sm:$0xff] }
  0x25   :  { %127 = vmatmul.bf16.vlgmr.msra.gmra.mxu0 %v67_v15  ;;  %v1034_v15 = vld [vmem:[#allocation2 + $0x1a0] sm:$0xff] }
  0x26   :  { %362 = vmatpush.bf16.msra.mxu3 %v1007_v45  ;;  %461 = vmatpush.bf16.msrb.mxu0 %v1021_v47  ;;  %v1056_v47 = vld [vmem:[%s1141_s2 + $0x7] ss:$0 sm:$0xff] }
  0x27   :  { %297 = vmatpush.bf16.msra.mxu2 %v998_v31  ;;  %527 = vmatpush.bf16.msrb.mxu1 %v1029_v61  ;;  %v1040_v31 = vld [vmem:[#allocation2 + $0x1d0] sm:$0xff] }
  0x2a   :  { %363 = vmatpush.bf16.msra.mxu3 %v1006_v46  ;;  %462 = vmatpush.bf16.msrb.mxu0 %v1020_v48 }
  0x2b   :  { %528 = vmatpush.bf16.msrb.mxu1 %v1028_v62  ;;  %632 = vmatpush.bf16.msrb.mxu2 %v1037_v12 }
  0x2e   :  { %463 = vmatpush.bf16.msrb.mxu0 %v1019_v49 }
  0x2f   :  { %529 = vmatpush.bf16.msrb.mxu1 %v1027_v63  ;;  %633 = vmatpush.bf16.msrb.mxu2 %v1036_v13 }
  0x32   :  { %464 = vmatpush.bf16.msrb.mxu0 %v1018_v50 }
  0x33   :  { %530 = vmatpush.bf16.msrb.mxu1 %v1026_v0 }
  0x36   :  { %465 = vmatpush.bf16.msrb.mxu0 %v1017_v51 }
  0x37   :  { %531 = vmatpush.bf16.msrb.mxu1 %v1025_v1 }
  0x3a   :  { %466 = vmatpush.bf16.msrb.mxu0 %v1016_v52 }
  0x3b   :  { %532 = vmatpush.bf16.msrb.mxu1 %v1024_v2 }
  0x3e   :  { %467 = vmatpush.bf16.msrb.mxu0 %v1015_v59 }
  0x3f   :  { %533 = vmatpush.bf16.msrb.mxu1 %v1023_v10 }
  0x42   :  { %468 = vmatpush.bf16.msrb.mxu0 %v1014_v60 }
  0x43   :  { %534 = vmatpush.bf16.msrb.mxu1 %v1022_v11 }
  0xa2   :  { %v128_v25 = vpop.f32.mrf.mxu0 }
  0xa3   :  { %v129_v26 = vadd.f32 %v1049_v24, %v128_v25  ;;  %v1031_v24 = vld [vmem:[#allocation2 + $0x188] sm:$0xff]  ;;  %v1030_v25 = vld [vmem:[#allocation2 + $0x180] sm:$0xff] }
  0xa5   :  { %v132_v27 = vmax.f32 %v129_v26, 0.0  ;;  %v1045_v26 = vld [vmem:[#allocation2 + $0x1f8] sm:$0xff] }
  0xa6   :  { %698 = vmatpush.bf16.msrb.mxu3 %v1045_v26 }
  0xa7   :  { %v133_v28 = vpack.c.bf16 %v132_v27, %v132_v27  ;;  %v1044_v27 = vld [vmem:[#allocation2 + $0x1f0] sm:$0xff] }
  0xa9   :  { %193 = vmatmul.bf16.vlgmr.msra.gmra.mxu1 %v133_v28  ;;  %v1043_v28 = vld [vmem:[#allocation2 + $0x1e8] sm:$0xff] }
  0xaa   :  { %v130_v29 = vpop.f32.mrf.mxu0  ;;  %699 = vmatpush.bf16.msrb.mxu3 %v1044_v27 }
  0xab   :  { %v1042_v29 = vld [vmem:[#allocation2 + $0x1e0] sm:$0xff] }
  0xae   :  { %700 = vmatpush.bf16.msrb.mxu3 %v1043_v28 }
  0xb2   :  { %701 = vmatpush.bf16.msrb.mxu3 %v1042_v29 }
  0xb6   :  { %702 = vmatpush.bf16.msrb.mxu3 %v1041_v30 }
  0xba   :  { %703 = vmatpush.bf16.msrb.mxu3 %v1040_v31 }
 0x126   :  { %v194_v39 = vpop.f32.mrf.mxu1 }
 0x127   :  { %v195_v40 = vadd.f32 %v1050_v38, %v194_v39  ;;  %v1039_v39 = vld [vmem:[#allocation2 + $0x1c8] sm:$0xff] }
 0x128   :  { %704 = vmatpush.bf16.msrb.mxu3 %v1039_v39 }
 0x129   :  { %v198_v41 = vmax.f32 %v195_v40, 0.0  ;;  %v1038_v40 = vld [vmem:[#allocation2 + $0x1c0] sm:$0xff] }
 0x12b   :  { %v199_v42 = vadd.f32 %v198_v41, %v30_v14  ;;  %v1035_v14 = vld [vmem:[#allocation2 + $0x1a8] sm:$0xff]  ;;  %v1055_v41 = vld [vmem:[%s1141_s2 + $0x6] ss:$0 sm:$0xff] }
 0x12c   :  { %634 = vmatpush.bf16.msrb.mxu2 %v1035_v14  ;;  %705 = vmatpush.bf16.msrb.mxu3 %v1038_v40 }
 0x12d   :  { %v238_v43 = vpack.c.bf16 %v199_v42, %v199_v42 }
 0x12e   :  { %v196_v44 = vpop.f32.mrf.mxu1 }
 0x12f   :  { %298 = vmatmul.bf16.vlgmr.msra.gmra.mxu2 %v238_v43 }
 0x130   :  { %635 = vmatpush.bf16.msrb.mxu2 %v1034_v15 }
 0x134   :  { %636 = vmatpush.bf16.msrb.mxu2 %v1033_v16 }
 0x138   :  { %637 = vmatpush.bf16.msrb.mxu2 %v1032_v17 }
 0x13c   :  { %638 = vmatpush.bf16.msrb.mxu2 %v1031_v24 }
 0x140   :  { %639 = vmatpush.bf16.msrb.mxu2 %v1030_v25 }
 0x1b2   :  { %v299_v54 = vpop.f32.mrf.mxu2 }
 0x1b3   :  { %v300_v55 = vadd.f32 %v1051_v53, %v299_v54 }
 0x1b5   :  { %v303_v56 = vmax.f32 %v300_v55, 0.0 }
 0x1b7   :  { %v304_v57 = vpack.c.bf16 %v303_v56, %v303_v56 }
 0x1b9   :  { %364 = vmatmul.bf16.vlgmr.msra.gmra.mxu3 %v304_v57 }
 0x1ba   :  { %v301_v58 = vpop.f32.mrf.mxu2 }
 0x23c   :  { %v365_v4 = vpop.f32.mrf.mxu3 }
 0x23d   :  { %v366_v5 = vadd.f32 %v1052_v3, %v365_v4 }
 0x23f   :  { %v369_v6 = vmax.f32 %v366_v5, 0.0 }
 0x241   :  { %v370_v7 = vadd.f32 %v369_v6, %v199_v42 }
 0x243   :  { %v409_v8 = vpack.c.bf16 %v370_v7, %v370_v7 }
 0x244   :  { %v367_v9 = vpop.f32.mrf.mxu3 }
 0x245   :  { %469 = vmatmul.bf16.vlgmr.msrb.gmra.mxu0 %v409_v8 }
 0x2c2   :  { %v470_v19 = vpop.f32.mrf.mxu0 }
 0x2c3   :  { %v471_v20 = vadd.f32 %v1053_v18, %v470_v19 }
 0x2c5   :  { %v474_v21 = vmax.f32 %v471_v20, 0.0 }
 0x2c7   :  { %v475_v22 = vpack.c.bf16 %v474_v21, %v474_v21 }
 0x2c9   :  { %535 = vmatmul.bf16.vlgmr.msrb.gmra.mxu1 %v475_v22 }
 0x2ca   :  { %v472_v23 = vpop.f32.mrf.mxu0 }
 0x346   :  { %v536_v33 = vpop.f32.mrf.mxu1 }
 0x347   :  { %v537_v34 = vadd.f32 %v1054_v32, %v536_v33 }
 0x349   :  { %v540_v35 = vmax.f32 %v537_v34, 0.0 }
 0x34b   :  { %v541_v36 = vadd.f32 %v540_v35, %v370_v7 }
 0x34d   :  { %v580_v37 = vpack.c.bf16 %v541_v36, %v541_v36 }
 0x34e   :  { %v538_v38 = vpop.f32.mrf.mxu1 }
 0x34f   :  { %640 = vmatmul.bf16.vlgmr.msrb.gmra.mxu2 %v580_v37 }
 0x3d2   :  { %v641_v42 = vpop.f32.mrf.mxu2 }
 0x3d3   :  { %v642_v43 = vadd.f32 %v1055_v41, %v641_v42 }
 0x3d5   :  { %v645_v44 = vmax.f32 %v642_v43, 0.0 }
 0x3d7   :  { %v646_v45 = vpack.c.bf16 %v645_v44, %v645_v44 }
 0x3d9   :  { %706 = vmatmul.bf16.vlgmr.msrb.gmra.mxu3 %v646_v45 }
 0x3da   :  { %v643_v46 = vpop.f32.mrf.mxu2 }
 0x45c   :  { %v707_v48 = vpop.f32.mrf.mxu3 }
 0x45d   :  { %v708_v49 = vadd.f32 %v1056_v47, %v707_v48 }
 0x45f   :  { %v711_v50 = vmax.f32 %v708_v49, 0.0 }
 0x461   :  { %v712_v51 = vadd.f32 %v711_v50, %v541_v36 }
 0x463   :  { %713 = vst [vmem:[%s1142_s3] sm:$0xf] %v712_v51 }
 0x464   :  { %v709_v52 = vpop.f32.mrf.mxu3 }
 0x465   :  { %718 = vsyncpa [#allocation3], 1 }

</bundles_post_ra>
